<compile_context>
chip_gen: v5e
topology: v5e:2x2
jax: 0.10.0
libtpu: 0.0.40
codegen_flags: <defaults>
</compile_context>

<pallas_src>
from functools import partial

import jax
import jax.numpy as jnp
from jax.experimental import pallas as pl
from jax.experimental.pallas import tpu as pltpu


# ----------------------------------------------------------------------------
# Fused CALayer kernel: one grid step == one batch element.
#   x_ref : (1, C, HW)   input feature map (C on sublanes, HW on lanes)
#   w1_ref: (C, MID)     FC1 weight, laid out so FC1 is a sublane reduction
#   b1_ref: (1, MID)
#   w2_ref: (C, MID)     FC2 weight (PyTorch (C, MID, 1, 1) reshaped), lane reduction
#   b2_ref: (C, 1)
#   o_ref : (1, C, HW)   x * sigmoid(FC2(relu(FC1(mean(x)))))
# ----------------------------------------------------------------------------
def _ca_kernel(x_ref, w1_ref, b1_ref, w2_ref, b2_ref, o_ref, *, inv_hw):
    x = x_ref[0].astype(jnp.float32)                                  # (C, HW)

    # AdaptiveAvgPool2d(1): per-channel spatial mean (lane reduction on the XLU).
    mean = jnp.sum(x, axis=1, keepdims=True) * inv_hw                 # (C, 1)

    # FC1 (1x1 conv C -> MID) + ReLU, as broadcast-multiply + sublane reduction.
    h = jnp.sum(mean * w1_ref[...], axis=0, keepdims=True) + b1_ref[...]   # (1, MID)
    h = jnp.maximum(h, 0.0)

    # FC2 (1x1 conv MID -> C) + sigmoid, as broadcast-multiply + lane reduction.
    g = jnp.sum(h * w2_ref[...], axis=1, keepdims=True) + b2_ref[...]      # (C, 1)
    gate = jax.nn.sigmoid(g)                                               # (C, 1)

    # Re-scale the feature map: per-channel gate broadcast across all lanes.
    o_ref[0] = (x * gate).astype(o_ref.dtype)


# ----------------------------------------------------------------------------
# Wrapper. Accepts PyTorch-layout parameters:
#   w1: (MID, C, 1, 1)  b1: (MID,)
#   w2: (C, MID, 1, 1)  b2: (C,)
# and NCHW input x: (N, C, H, W).
# ----------------------------------------------------------------------------
@jax.jit
def ca_layer_pallas(x, w1, b1, w2, b2):
    n, c, h, w = x.shape
    hw = h * w
    mid = w1.shape[0]

    # One-time tiny layout conversions (done by XLA, outside the hot kernel).
    w1k = jnp.transpose(w1.reshape(mid, c), (1, 0)).astype(jnp.float32)   # (C, MID)
    b1k = b1.reshape(1, mid).astype(jnp.float32)
    w2k = w2.reshape(c, mid).astype(jnp.float32)                          # (C, MID)
    b2k = b2.reshape(c, 1).astype(jnp.float32)

    xr = x.reshape(n, c, hw)   # free reshape: lanes = spatial, sublanes = channels

    out = pl.pallas_call(
        partial(_ca_kernel, inv_hw=1.0 / float(hw)),
        out_shape=jax.ShapeDtypeStruct((n, c, hw), x.dtype),
        grid=(n,),
        in_specs=[
            pl.BlockSpec((1, c, hw), lambda i: (i, 0, 0)),
            pl.BlockSpec((c, mid), lambda i: (0, 0)),
            pl.BlockSpec((1, mid), lambda i: (0, 0)),
            pl.BlockSpec((c, mid), lambda i: (0, 0)),
            pl.BlockSpec((c, 1), lambda i: (0, 0)),
        ],
        out_specs=pl.BlockSpec((1, c, hw), lambda i: (i, 0, 0)),
        compiler_params=pltpu.CompilerParams(
            dimension_semantics=("parallel",)),
    )(xr, w1k, b1k, w2k, b2k)

    return out.reshape(n, c, h, w)


# ----------------------------------------------------------------------------
# Pure-JAX reference (mirrors the PyTorch CALayer forward) for correctness check.
# ----------------------------------------------------------------------------
def ca_layer_ref(x, w1, b1, w2, b2):
    n, c, h, w = x.shape
    mid = w1.shape[0]
    y = jnp.mean(x, axis=(2, 3))                                    # (N, C)
    y = jnp.maximum(y @ w1.reshape(mid, c).T + b1, 0.0)             # (N, MID)
    y = jax.nn.sigmoid(y @ w2.reshape(c, mid).T + b2)               # (N, C)
    return x * y[:, :, None, None]


# ----------------------------------------------------------------------------
if __name__ == "__main__":
    N, C, H, W = 2, 32, 16, 16          # small shapes; H*W = 256 keeps lanes dense
    reduction = 16
    MID = C // reduction                # = 2

    key = jax.random.PRNGKey(0)
    kx, kw1, kb1, kw2, kb2 = jax.random.split(key, 5)
    x = jax.random.normal(kx, (N, C, H, W), jnp.float32)
    w1 = 0.1 * jax.random.normal(kw1, (MID, C, 1, 1), jnp.float32)   # Conv2d(C, C//16, 1)
    b1 = 0.1 * jax.random.normal(kb1, (MID,), jnp.float32)
    w2 = 0.1 * jax.random.normal(kw2, (C, MID, 1, 1), jnp.float32)   # Conv2d(C//16, C, 1)
    b2 = 0.1 * jax.random.normal(kb2, (C,), jnp.float32)

    out = ca_layer_pallas(x, w1, b1, w2, b2)
    out = jax.block_until_ready(out)

    ref = ca_layer_ref(x, w1, b1, w2, b2)
    assert out.shape == (N, C, H, W), out.shape
    assert bool(jnp.all(jnp.isfinite(out)))
    assert bool(jnp.allclose(out, ref, rtol=1e-5, atol=1e-5)), float(
        jnp.max(jnp.abs(out - ref)))

    print("KERNEL_OK")
</pallas_src>

<mosaic_0001>
module attributes {stable_mosaic.version = 11 : i64} {
  func.func @_ca_kernel(%arg0: i32, %arg1: memref<1x32x256xf32, #tpu.memory_space<vmem>>, %arg2: memref<32x2xf32, #tpu.memory_space<vmem>>, %arg3: memref<1x2xf32, #tpu.memory_space<vmem>>, %arg4: memref<32x2xf32, #tpu.memory_space<vmem>>, %arg5: memref<32x1xf32, #tpu.memory_space<vmem>>, %arg6: memref<1x32x256xf32, #tpu.memory_space<vmem>>) attributes {dimension_semantics = [#tpu.dimension_semantics<parallel>], iteration_bounds = array<i64: 2>, scalar_prefetch = 0 : i64, scratch_operands = 0 : i64, tpu.core_type = #tpu.core_type<tc>, window_params = [{transform_indices = @transform_0, window_bounds = array<i64: 1, 32, 256>}, {pipeline_mode = #tpu.pipeline_mode<synchronous>, transform_indices = @transform_1, window_bounds = array<i64: 32, 2>}, {pipeline_mode = #tpu.pipeline_mode<synchronous>, transform_indices = @transform_2, window_bounds = array<i64: 1, 2>}, {pipeline_mode = #tpu.pipeline_mode<synchronous>, transform_indices = @transform_3, window_bounds = array<i64: 32, 2>}, {pipeline_mode = #tpu.pipeline_mode<synchronous>, transform_indices = @transform_4, window_bounds = array<i64: 32, 1>}, {transform_indices = @transform_5, window_bounds = array<i64: 1, 32, 256>}]} {
    %c0 = arith.constant 0 : index
    %c0_0 = arith.constant 0 : index
    %c0_1 = arith.constant 0 : index
    %0 = vector.load %arg1[%c0, %c0_0, %c0_1] : memref<1x32x256xf32, #tpu.memory_space<vmem>>, vector<1x32x256xf32>
    %1 = vector.shape_cast %0 : vector<1x32x256xf32> to vector<32x256xf32>
    %cst = arith.constant dense<0.000000e+00> : vector<32xf32>
    %2 = vector.multi_reduction <add>, %1, %cst [1] : vector<32x256xf32> to vector<32xf32>
    %3 = vector.shape_cast %2 : vector<32xf32> to vector<32x1xf32>
    %cst_2 = arith.constant 3.906250e-03 : f32
    %4 = vector.broadcast %cst_2 : f32 to vector<32x1xf32>
    %5 = arith.mulf %3, %4 : vector<32x1xf32>
    %c0_3 = arith.constant 0 : index
    %c0_4 = arith.constant 0 : index
    %6 = vector.load %arg2[%c0_3, %c0_4] : memref<32x2xf32, #tpu.memory_space<vmem>>, vector<32x2xf32>
    %7 = vector.broadcast %5 : vector<32x1xf32> to vector<32x2xf32>
    %8 = arith.mulf %7, %6 : vector<32x2xf32>
    %cst_5 = arith.constant dense<0.000000e+00> : vector<2xf32>
    %9 = vector.multi_reduction <add>, %8, %cst_5 [0] : vector<32x2xf32> to vector<2xf32>
    %10 = vector.shape_cast %9 : vector<2xf32> to vector<1x2xf32>
    %c0_6 = arith.constant 0 : index
    %c0_7 = arith.constant 0 : index
    %11 = vector.load %arg3[%c0_6, %c0_7] : memref<1x2xf32, #tpu.memory_space<vmem>>, vector<1x2xf32>
    %12 = arith.addf %10, %11 : vector<1x2xf32>
    %cst_8 = arith.constant 0.000000e+00 : f32
    %13 = vector.broadcast %cst_8 : f32 to vector<1x2xf32>
    %14 = arith.maximumf %12, %13 : vector<1x2xf32>
    %c0_9 = arith.constant 0 : index
    %c0_10 = arith.constant 0 : index
    %15 = vector.load %arg4[%c0_9, %c0_10] : memref<32x2xf32, #tpu.memory_space<vmem>>, vector<32x2xf32>
    %16 = vector.broadcast %14 : vector<1x2xf32> to vector<32x2xf32>
    %17 = arith.mulf %16, %15 : vector<32x2xf32>
    %cst_11 = arith.constant dense<0.000000e+00> : vector<32xf32>
    %18 = vector.multi_reduction <add>, %17, %cst_11 [1] : vector<32x2xf32> to vector<32xf32>
    %19 = vector.shape_cast %18 : vector<32xf32> to vector<32x1xf32>
    %c0_12 = arith.constant 0 : index
    %c0_13 = arith.constant 0 : index
    %20 = vector.load %arg5[%c0_12, %c0_13] : memref<32x1xf32, #tpu.memory_space<vmem>>, vector<32x1xf32>
    %21 = arith.addf %19, %20 : vector<32x1xf32>
    %22 = arith.negf %21 : vector<32x1xf32>
    %23 = math.exp %22 : vector<32x1xf32>
    %cst_14 = arith.constant 1.000000e+00 : f32
    %24 = vector.broadcast %cst_14 : f32 to vector<32x1xf32>
    %25 = arith.addf %24, %23 : vector<32x1xf32>
    %26 = arith.divf %24, %25 : vector<32x1xf32>
    %27 = vector.broadcast %26 : vector<32x1xf32> to vector<32x256xf32>
    %28 = arith.mulf %1, %27 : vector<32x256xf32>
    %c0_15 = arith.constant 0 : index
    %c0_16 = arith.constant 0 : index
    %c0_17 = arith.constant 0 : index
    %29 = vector.load %arg6[%c0_15, %c0_16, %c0_17] : memref<1x32x256xf32, #tpu.memory_space<vmem>>, vector<1x32x256xf32>
    %30 = vector.shape_cast %29 : vector<1x32x256xf32> to vector<32x256xf32>
    %31 = vector.shape_cast %28 : vector<32x256xf32> to vector<1x32x256xf32>
    tpu.vector_store %arg6[%c0_15, %c0_16, %c0_17], %31 {strides = array<i32>} : memref<1x32x256xf32, #tpu.memory_space<vmem>>, vector<1x32x256xf32>,
    return
  }
  func.func @transform_0(%arg0: i32) -> (i32, i32, i32) {
    %c0_i32 = arith.constant 0 : i32
    %c0_i32_0 = arith.constant 0 : i32
    %c0_i32_1 = arith.constant 0 : i32
    return %arg0, %c0_i32, %c0_i32_0 : i32, i32, i32
  }
  func.func @transform_1(%arg0: i32) -> (i32, i32) {
    %c0_i32 = arith.constant 0 : i32
    %c0_i32_0 = arith.constant 0 : i32
    %c0_i32_1 = arith.constant 0 : i32
    return %c0_i32, %c0_i32_0 : i32, i32
  }
  func.func @transform_2(%arg0: i32) -> (i32, i32) {
    %c0_i32 = arith.constant 0 : i32
    %c0_i32_0 = arith.constant 0 : i32
    %c0_i32_1 = arith.constant 0 : i32
    return %c0_i32, %c0_i32_0 : i32, i32
  }
  func.func @transform_3(%arg0: i32) -> (i32, i32) {
    %c0_i32 = arith.constant 0 : i32
    %c0_i32_0 = arith.constant 0 : i32
    %c0_i32_1 = arith.constant 0 : i32
    return %c0_i32, %c0_i32_0 : i32, i32
  }
  func.func @transform_4(%arg0: i32) -> (i32, i32) {
    %c0_i32 = arith.constant 0 : i32
    %c0_i32_0 = arith.constant 0 : i32
    %c0_i32_1 = arith.constant 0 : i32
    return %c0_i32, %c0_i32_0 : i32, i32
  }
  func.func @transform_5(%arg0: i32) -> (i32, i32, i32) {
    %c0_i32 = arith.constant 0 : i32
    %c0_i32_0 = arith.constant 0 : i32
    %c0_i32_1 = arith.constant 0 : i32
    return %arg0, %c0_i32, %c0_i32_0 : i32, i32, i32
  }
}

</mosaic_0001>

<bundles_post_ra>
// kernel: ca_layer_pallas.1
= control target key start
LH: loop header
LB: loop body
LE: loop exit
PB: predicated region body
PF: predicated region fallthrough
CT: control target
= control target key end

     0   :  { %s554_s18 = smov 0   ;;  %s657_s0 = inlined_call_operand.vmem [shape: f32[2,32,256], index: 0, kind: input, shape index: {}]   ;;  %s658_s1 = inlined_call_operand.vmem [shape: f32[32,2], index: 1, kind: input, shape index: {}]   ;;  %s659_s2 = inlined_call_operand.vmem [shape: f32[1,2], index: 2, kind: input, shape index: {}]   ;;  %s660_s3 = inlined_call_operand.vmem [shape: f32[32,2], index: 3, kind: input, shape index: {}]   ;;  %s661_s4 = inlined_call_operand.vmem [shape: f32[32,1], index: 4, kind: input, shape index: {}]   ;;  %s662_s5 = inlined_call_operand.vmem [shape: f32[2,32,256], index: 5, kind: output, shape index: {}]  }
   0x1 LB: > { %s470_s19 = sadd.s32 4294967295, %s521_s18   ;;  %p474_p0 = scmp.ge.s32.totalorder %s521_s18, 1  ;;  %s521_s18 = sphi %s554_s18, %s15_s18  }
   0x2   : > { %p187_p1 = scmp.lt.s32.totalorder %s521_s18, 3 }
   0x4   : > { %p188_p2 = pnand %p474_p0, %p187_p1 }
   0x5   : > { %p215_p3 = scmp.lt.s32.totalorder (!%p188_p2), %s470_s19, 1 }
   0x6   : > { %191 = sbr.rel (%p188_p2) target bundleno = 450 (0x1c2), region = 40 }
   0xb   : > { %s664_s19 = smov (!%p215_p3, %s470_s19), 1  ;;  %v249_v15 = vld [vmem:[%s658_s1] sm:$0xff]  ;;  %v251_v17 = vld [vmem:[%s658_s1 + $0x10] sm:$0xff]  ;;  %v250_v18 = vld [vmem:[%s658_s1 + $0x8] sm:$0xff]  ;;  %vm257_vm0 = vcmask 15360   ;;  %v523_v57 = vmov 0  }
   0xc   : > { %s485_s20 = sshll.u32 %s664_s19, 6  ;;  %v252_v22 = vld [vmem:[%s658_s1 + $0x18] sm:$0xff]  ;;  %v271_v40 = vld [vmem:[%s659_s2] sm:$0x1]  ;;  %v276_v45 = vld [vmem:[%s660_s3 + $0x10] sm:$0xff]  ;;  %498 = vset.pattern.permute.xlu1 %v523_v57  ;;  %496 = vset.pattern.permute.xlu2 %v523_v57 }
   0xd   : > { %s219_s23 = scalar_lea.vmem %s657_s0, %s485_s20  ;;  %v277_v44 = vld [vmem:[%s660_s3 + $0x18] sm:$0xff]  ;;  %v274_v46 = vld [vmem:[%s660_s3] sm:$0xff]  ;;  %v275_v54 = vld [vmem:[%s660_s3 + $0x8] sm:$0xff]  ;;  %497 = vset.pattern.permute.xlu0 %v523_v57  ;;  %s224_s30 = scalar_lea.vmem %s662_s5, %s485_s20 }
   0xe   : > { %v570_v0 = vld [vmem:[%s219_s23] sm:$0xff]  ;;  %v572_v1 = vld [vmem:[%s219_s23 + $0x8] sm:$0xff]  ;;  %v582_v6 = vld [vmem:[%s219_s23 + $0x10] sm:$0xff] }
   0xf   : > { %v574_v2 = vld [vmem:[%s219_s23 + $0x20] sm:$0xff]  ;;  %v233_v3 = vadd.f32 %v572_v1, %v570_v0  ;;  %v578_v4 = vld [vmem:[%s219_s23 + $0x28] sm:$0xff]  ;;  %v584_v7 = vld [vmem:[%s219_s23 + $0x18] sm:$0xff] }
  0x10   : > { %v239_v5 = vadd.f32 %v578_v4, %v574_v2  ;;  %v586_v8 = vld [vmem:[%s219_s23 + $0x30] sm:$0xff]  ;;  %v588_v9 = vld [vmem:[%s219_s23 + $0x38] sm:$0xff]  ;;  %v236_v10 = vadd.f32 %v584_v7, %v582_v6  ;;  %v295_v60 = vld [vmem:[%s661_s4] sm:$0xff] }
  0x11   : > { %234 = vadd.xlane.f32.xlu0 %v233_v3  ;;  %v242_v11 = vadd.f32 %v588_v9, %v586_v8  ;;  %v298_v58 = vld [vmem:[%s661_s4 + $0x18] sm:$0xff]  ;;  %v297_v59 = vld [vmem:[%s661_s4 + $0x10] sm:$0xff] }
  0x12   : > { %240 = vadd.xlane.f32.xlu1 %v239_v5 }
  0x19   : > { %237 = vadd.xlane.f32.xlu0 %v236_v10 }
  0x1a   : > { %243 = vadd.xlane.f32.xlu1 %v242_v11 }
  0x84   : > { %v235_v12 = vpop.xlane.xlu0 %234 }
  0x85   : > { %v241_v13 = vpop.xlane.xlu1 %240  ;;  %v245_v14 = vmul.f32 0.00390625, %v235_v12 }
  0x86   : > { %v247_v16 = vmul.f32 0.00390625, %v241_v13 }
  0x87   : > { %v253_v20 = vmul.f32 %v249_v15, %v245_v14  ;;  %v296_v14 = vld [vmem:[%s661_s4 + $0x8] sm:$0xff] }
  0x88   : > { %v255_v25 = vmul.f32 %v251_v17, %v247_v16 }
  0x89   : > { %v258_v28 = vsel %vm257_vm0, %v253_v20, 0.0 }
  0x8a   : > { %v261_v31 = vsel %vm257_vm0, %v255_v25, 0.0 }
  0x8c   : > { %v238_v19 = vpop.xlane.xlu0 %237 }
  0x8d   : > { %v246_v21 = vmul.f32 0.00390625, %v238_v19  ;;  %v244_v23 = vpop.xlane.xlu1 %243 }
  0x8e   : > { %v248_v24 = vmul.f32 0.00390625, %v244_v23 }
  0x8f   : > { %v254_v26 = vmul.f32 %v250_v18, %v246_v21 }
  0x90   : > { %v256_v27 = vmul.f32 %v252_v22, %v248_v24 }
  0x91   : > { %v259_v29 = vsel %vm257_vm0, %v254_v26, 0.0 }
  0x92   : > { %v260_v30 = vadd.f32 %v259_v29, %v258_v28  ;;  %v263_v32 = vsel %vm257_vm0, %v256_v27, 0.0 }
  0x94   : > { %v262_v33 = vadd.f32 %v261_v31, %v260_v30 }
  0x96   : > { %v264_v34 = vadd.f32 %v263_v32, %v262_v33 }
  0x98   : > { %v265_v35 = vrot.slane %v264_v34, 4 }
  0x9a   : > { %v266_v36 = vadd.f32 %v265_v35, %v264_v34 }
  0x9c   : > { %v267_v37 = vrot.slane %v266_v36, 2 }
  0x9e   : > { %v268_v38 = vadd.f32 %v267_v37, %v266_v36 }
  0xa0   : > { %v269_v39 = vrot.slane %v268_v38, 1 }
  0xa2   : > { %v270_v41 = vadd.f32 %v269_v39, %v268_v38 }
  0xa4   : > { %v272_v42 = vadd.f32 %v271_v40, %v270_v41 }
  0xa6   : > { %v273_v43 = vmax.f32 %v272_v42, 0.0 }
  0xa8   : > { %v278_v47 = vperm.slane %v273_v43, 0 }
  0xaa   : > { %v282_v48 = vmul.f32 %v278_v47, %v277_v44  ;;  %v281_v49 = vmul.f32 %v278_v47, %v276_v45  ;;  %v279_v50 = vmul.f32 %v278_v47, %v274_v46  ;;  %v280_v55 = vmul.f32 %v278_v47, %v275_v54 }
  0xac   : > { %v292_v51 = vsel %vm257_vm0, %v282_v48, 0.0  ;;  %v289_v52 = vsel %vm257_vm0, %v281_v49, 0.0  ;;  %v283_v53 = vsel %vm257_vm0, %v279_v50, 0.0  ;;  %v286_v56 = vsel %vm257_vm0, %v280_v55, 0.0 }
  0xad   : > { %293 = vadd.xlane.f32.xlu1 %v292_v51  ;;  %290 = vadd.xlane.f32.xlu0 %v289_v52 }
  0xae   : > { %284 = vadd.xlane.f32.xlu2 %v283_v53 }
  0xb6   : > { %287 = vadd.xlane.f32.xlu2 %v286_v56 }
 0x120   : > { %v294_v61 = vpop.xlane.xlu1 %293  ;;  %v291_v62 = vpop.xlane.xlu0 %290 }
 0x121   : > { %v302_v63 = vadd.f32 %v298_v58, %v294_v61  ;;  %v301_v3 = vadd.f32 %v297_v59, %v291_v62  ;;  %v285_v5 = vpop.xlane.xlu2 %284 }
 0x122   : > { %v299_v10 = vadd.f32 %v295_v60, %v285_v5 }
 0x123   : > { %v482_v11 = vmul.f32 -1.442695, %v302_v63  ;;  %v481_v12 = vmul.f32 -1.442695, %v301_v3 }
 0x124   : > { %v479_v13 = vmul.f32 -1.442695, %v299_v10 }
 0x125   : > { %499 = vpow2.f32 %v482_v11 }
 0x126   : > { %501 = vpow2.f32 %v481_v12 }
 0x127   : > { %503 = vpow2.f32 %v479_v13 }
 0x129   : > { %v288_v15 = vpop.xlane.xlu2 %287 }
 0x12a   : > { %v300_v16 = vadd.f32 %v296_v14, %v288_v15 }
 0x12b   : > { %v500_v17 = vpop.eup %499 }
 0x12c   : > { %v502_v18 = vpop.eup %501  ;;  %v318_v19 = vadd.f32 1.0, %v500_v17  ;;  %v480_v22 = vmul.f32 -1.442695, %v300_v16 }
 0x12d   : > { %v504_v20 = vpop.eup %503  ;;  %v317_v21 = vadd.f32 1.0, %v502_v18 }
 0x12e   : > { %505 = vrcp.f32 %v318_v19  ;;  %v315_v23 = vadd.f32 1.0, %v504_v20  ;;  %v375_v53 = vand.u32 2147483648, %v318_v19  ;;  %vm369_vm10 = vweird.f32 %v318_v19 }
 0x12f   : > { %507 = vrcp.f32 %v317_v21  ;;  %v358_v33 = vand.u32 2147483647, %v317_v21  ;;  %v360_v34 = vand.u32 2147483648, %v317_v21  ;;  %vm354_vm3 = vweird.f32 %v317_v21 }
 0x130   : > { %509 = vrcp.f32 %v315_v23  ;;  %v330_v38 = vand.u32 2147483648, %v315_v23  ;;  %v328_v40 = vand.u32 2147483647, %v315_v23  ;;  %vm324_vm5 = vweird.f32 %v315_v23 }
 0x131   : > { %511 = vpow2.f32 %v480_v22  ;;  %v361_v42 = vor.u32 1.1754944e-38, %v360_v34  ;;  %vm359_vm6 = vcmp.eq.f32.partialorder %v358_v33, 8.507059e+37  ;;  %v373_v54 = vand.u32 2147483647, %v318_v19 }
 0x132   : > { %v331_v46 = vor.u32 1.1754944e-38, %v330_v38  ;;  %vm329_vm8 = vcmp.eq.f32.partialorder %v328_v40, 8.507059e+37  ;;  %v376_v60 = vor.u32 1.1754944e-38, %v375_v53 }
 0x133   : > { %vm374_vm13 = vcmp.eq.f32.partialorder %v373_v54, 8.507059e+37 }
 0x134   : > { %v506_v24 = vpop.eup %505 }
 0x135   : > { %v508_v25 = vpop.eup %507  ;;  %v365_v26 = vmul.f32 %v506_v24, %v318_v19  ;;  %vm370_vm9 = vweird.f32 %v506_v24 }
 0x136   : > { %v510_v27 = vpop.eup %509  ;;  %v350_v28 = vmul.f32 %v508_v25, %v317_v21  ;;  %vm355_vm1 = vweird.f32 %v508_v25  ;;  %vm371_vm11 = vmor %vm369_vm10, %vm370_vm9 }
 0x137   : > { %v512_v29 = vpop.eup %511  ;;  %v320_v30 = vmul.f32 %v510_v27, %v315_v23  ;;  %v366_v36 = vsub.f32 1.0, %v365_v26  ;;  %vm325_vm2 = vweird.f32 %v510_v27  ;;  %vm356_vm4 = vmor %vm354_vm3, %vm355_vm1 }
 0x138   : > { %v316_v31 = vadd.f32 1.0, %v512_v29  ;;  %v351_v32 = vsub.f32 1.0, %v350_v28  ;;  %vm326_vm7 = vmor %vm324_vm5, %vm325_vm2 }
 0x139   : > { %v321_v35 = vsub.f32 1.0, %v320_v30  ;;  %v367_v44 = vmul.f32 %v506_v24, %v366_v36 }
 0x13a   : > { %513 = vrcp.f32 %v316_v31  ;;  %v352_v37 = vmul.f32 %v508_v25, %v351_v32  ;;  %v345_v56 = vand.u32 2147483648, %v316_v31  ;;  %v343_v59 = vand.u32 2147483647, %v316_v31 }
 0x13b   : > { %v322_v39 = vmul.f32 %v510_v27, %v321_v35  ;;  %v368_v51 = vadd.f32 %v506_v24, %v367_v44  ;;  %vm339_vm14 = vweird.f32 %v316_v31 }
 0x13c   : > { %v353_v41 = vadd.f32 %v508_v25, %v352_v37  ;;  %v346_v63 = vor.u32 1.1754944e-38, %v345_v56  ;;  %vm344_vm0 = vcmp.eq.f32.partialorder %v343_v59, 8.507059e+37 }
 0x13d   : > { %v323_v43 = vadd.f32 %v510_v27, %v322_v39  ;;  %v372_v57 = vsel %vm371_vm11, %v506_v24, %v368_v51 }
 0x13e   : > { %v357_v45 = vsel %vm356_vm4, %v508_v25, %v353_v41  ;;  %v377_v62 = vsel %vm374_vm13, %v376_v60, %v372_v57 }
 0x13f   : > { %v362_v47 = vsel %vm359_vm6, %v361_v42, %v357_v45  ;;  %v327_v48 = vsel %vm326_vm7, %v510_v27, %v323_v43 }
 0x140   : > { %v514_v49 = vpop.eup %513  ;;  %391 = vperm.xlu1 %498, %v362_v47   ;;  %v332_v50 = vsel %vm329_vm8, %v331_v46, %v327_v48 }
 0x141   : > { %381 = vperm.xlu2 %496, %v332_v50   ;;  %v335_v52 = vmul.f32 %v514_v49, %v316_v31  ;;  %vm340_vm12 = vweird.f32 %v514_v49 }
 0x142   : > { %vm341_vm15 = vmor %vm339_vm14, %vm340_vm12 }
 0x143   : > { %v336_v55 = vsub.f32 1.0, %v335_v52 }
 0x145   : > { %v337_v58 = vmul.f32 %v514_v49, %v336_v55 }
 0x147   : > { %v338_v61 = vadd.f32 %v514_v49, %v337_v58 }
 0x149   : > { %396 = vperm.xlu2 %496, %v377_v62   ;;  %v342_v3 = vsel %vm341_vm15, %v514_v49, %v338_v61 }
 0x14a   : > { %v347_v5 = vsel %vm344_vm0, %v346_v63, %v342_v3 }
 0x14b   : > { %386 = vperm.xlu0 %497, %v347_v5  }
 0x19b   : > { %v382_v10 = vpop.permute.xlu2 %381 }
 0x19c   : > { %v399_v11 = vmul.f32 %v382_v10, %v570_v0  ;;  %v400_v12 = vmul.f32 %v382_v10, %v572_v1 }
 0x19e   : > { %407 = vst [vmem:[%s224_s30] sm:$0xff] %v399_v11 }
 0x19f   : > { %408 = vst [vmem:[%s224_s30 + $0x8] sm:$0xff] %v400_v12 }
 0x1a3   : > { %v397_v13 = vpop.permute.xlu2 %396 }
 0x1a4   : > { %v405_v14 = vmul.f32 %v397_v13, %v586_v8  ;;  %v406_v15 = vmul.f32 %v397_v13, %v588_v9 }
 0x1a6   : > { %413 = vst [vmem:[%s224_s30 + $0x30] sm:$0xff] %v405_v14 }
 0x1a7   : > { %414 = vst [vmem:[%s224_s30 + $0x38] sm:$0xff] %v406_v15 }
 0x1b2   : > { %v392_v16 = vpop.permute.xlu1 %391 }
 0x1b3   : > { %v403_v17 = vmul.f32 %v392_v16, %v574_v2  ;;  %v404_v18 = vmul.f32 %v392_v16, %v578_v4 }
 0x1b5   : > { %411 = vst [vmem:[%s224_s30 + $0x20] sm:$0xff] %v403_v17 }
 0x1b6   : > { %412 = vst [vmem:[%s224_s30 + $0x28] sm:$0xff] %v404_v18 }
 0x1bd   : > { %v387_v19 = vpop.permute.xlu0 %386 }
 0x1be   : > { %v401_v0 = vmul.f32 %v387_v19, %v582_v6  ;;  %v402_v1 = vmul.f32 %v387_v19, %v584_v7 }
 0x1c0   : > { %409 = vst [vmem:[%s224_s30 + $0x10] sm:$0xff] %v401_v0 }
 0x1c1   : > { %410 = vst [vmem:[%s224_s30 + $0x18] sm:$0xff] %v402_v1 }
 0x1c2 PF: > { %s15_s18 = sadd.s32 1, %s521_s18  }
 0x1c3   : > { %p12_p4 = scmp.ge.s32.totalorder %s15_s18, 4  }
 0x1c5   :  { %14 = sbr.rel (!%p12_p4) target bundleno = 1 (0x1), region = 70 }

</bundles_post_ra>
